<compile_context>
chip_gen: v6e
topology: v6e:2x2x1
jax: 0.10.0
libtpu: 0.0.40
codegen_flags: <defaults>
</compile_context>

<pallas_src>
import functools
import math

import jax
import jax.numpy as jnp
from jax.experimental import pallas as pl
from jax.experimental.pallas import tpu as pltpu


# ----------------------------------- kernel ----------------------------------
def _graph_attn_kernel(block_b, seq_len, mm_dtype,
                       q_ref, k_ref, v_ref, bias_ref, p_ref,
                       wq_ref, bq_ref, wk_ref, bk_ref, wv_ref, bv_ref,
                       wo_ref, bo_ref, o_ref, acc_ref):
    h = pl.program_id(1)
    bb, M = block_b, seq_len
    hd = p_ref.shape[-1]

    # Per-head projections on the flattened [block_b*M, Din] rows.
    # bf16 MXU inputs, f32 accumulation; 1/sqrt(hd) is folded into wq/bq.
    Qh = jnp.dot(q_ref[...], wq_ref[0],
                 preferred_element_type=jnp.float32) + bq_ref[0]
    Kh = jnp.dot(k_ref[...], wk_ref[0],
                 preferred_element_type=jnp.float32) + bk_ref[0]
    Vh = jnp.dot(v_ref[...], wv_ref[0],
                 preferred_element_type=jnp.float32) + bv_ref[0]

    P = p_ref[...]                                   # [M, hd] = shared_rl_pe.sum(0)

    # [block_b, M, hd] views: leading-axis splits only (M is 8-aligned).
    Q3 = Qh.reshape(bb, M, hd).astype(mm_dtype)
    K3 = (Kh.reshape(bb, M, hd) + P[None]).astype(mm_dtype)   # fuses q @ P^T
    V3 = (Vh.reshape(bb, M, hd) + P[None]).astype(mm_dtype)   # fuses attn @ P

    # scores = Q (K+P)^T + mask_bias, batched over the block's batch entries.
    s = jnp.einsum('bqd,bkd->bqk', Q3, K3, preferred_element_type=jnp.float32)
    s = s + bias_ref[...]                            # [bb, 1, M] additive key mask
    s = s - jnp.max(s, axis=-1, keepdims=True)
    e = jnp.exp(s)
    attn = e * pl.reciprocal(jnp.sum(e, axis=-1, keepdims=True), approx=True)

    # context_h = attn (V+P): [bb, M, hd]
    ctx = jnp.einsum('bqk,bkd->bqd', attn.astype(mm_dtype), V3,
                     preferred_element_type=jnp.float32)

    @pl.when(h == 0)
    def _():
        acc_ref[...] = jnp.zeros_like(acc_ref)

    # Fused output projection accumulated over heads into a lane-dense
    # [rows, S] f32 scratch: out = sum_h ctx_h @ wo[h*hd:(h+1)*hd, :] + bo.
    acc_ref[...] += jnp.dot(ctx.reshape(bb * M, hd).astype(mm_dtype), wo_ref[0],
                            preferred_element_type=jnp.float32)

    @pl.when(h == pl.num_programs(1) - 1)
    def _():
        o_ref[...] = (acc_ref[...] + bo_ref[...]).astype(o_ref.dtype)


# --------------------------- block-size heuristics ----------------------------
def _vmem_bytes_estimate(block_b, M, Din, S, hd):
    """Rough per-step VMEM footprint (double-buffered blocks + live values)."""
    rows = block_b * M
    mmb = 2                                              # bf16 matmul operands
    act_in = 3 * 2 * rows * Din * mmb                    # q/k/v blocks (x2 buffers)
    out_blk = 2 * rows * S * 4                           # output block (x2 buffers)
    weights = 2 * (3 * Din * hd + hd * S) * mmb + 2 * 4 * S * 4
    scratch = rows * S * 4                               # output-proj accumulator
    interm = 3 * rows * hd * 4 + 3 * block_b * M * M * 4 + block_b * M * hd * 4
    misc = 2 * (M * hd + block_b * M) * 4                # P, mask bias
    return act_in + out_blk + weights + scratch + interm + misc


def _pick_block_b(B, M, Din, S, hd, target_rows, vmem_budget_bytes):
    """Batch entries per grid step: reach ~target_rows MXU rows, stay inside the
    VMEM budget, and keep >= 2 steps on the parallel grid axis whenever B >= 2
    (v7x megacore + pipelining) -- never fall back to the whole batch."""
    valid = []
    for d in range(1, B + 1):
        if B % d:
            continue
        if B >= 2 and B // d < 2:          # keep at least 2 parallel grid steps
            continue
        if _vmem_bytes_estimate(d, M, Din, S, hd) > vmem_budget_bytes:
            continue
        valid.append(d)
    if not valid:
        return 1
    for d in valid:                        # smallest block reaching the row target
        if d * M >= target_rows:
            return d
    return valid[-1]                       # else the largest block that fits


# ----------------------------------- wrapper ----------------------------------
def multi_headed_graph_attention(q, k, v, mask_f32, pe, params,
                                 num_heads, head_size, *,
                                 block_b=None,
                                 target_rows=256,        # 128 already fills v5e's MXU
                                 mm_dtype=jnp.bfloat16,
                                 out_dtype=jnp.float32,  # bf16 halves HBM write-back
                                 vmem_budget_bytes=40 * 1024 * 1024):
    """Fused graph-attention forward (projections + relative attention +
    output projection).  mask_f32 is [B, 1, M] with 1.0 = keep."""
    B, M, Din = q.shape
    H, hd = num_heads, head_size
    S = H * hd
    assert M % 8 == 0, "pad the sequence length to a multiple of 8 in the caller"

    if block_b is None:
        block_b = _pick_block_b(B, M, Din, S, hd, target_rows, vmem_budget_bytes)
    assert B % block_b == 0
    rows = block_b * M
    grid = (B // block_b, H)

    # ---- one-time parameter / input preparation (plain XLA, outside kernel) --
    scale = 1.0 / math.sqrt(hd)                 # folded query scale

    def head_major(w):                          # [Din, S] -> [H, Din, hd]
        return w.reshape(w.shape[0], H, hd).transpose(1, 0, 2)

    def head_major_bias(b):                     # [1, S] -> [H, 1, hd]
        return b.reshape(1, H, hd).transpose(1, 0, 2)

    wq = head_major(params["wq"] * scale).astype(mm_dtype)
    bq = head_major_bias(params["bq"] * scale).astype(jnp.float32)
    wk = head_major(params["wk"]).astype(mm_dtype)
    bk = head_major_bias(params["bk"]).astype(jnp.float32)
    wv = head_major(params["wv"]).astype(mm_dtype)
    bv = head_major_bias(params["bv"]).astype(jnp.float32)
    wo = params["wo"].reshape(H, hd, S).astype(mm_dtype)        # [H, hd, S]
    bo = params["bo"].astype(jnp.float32)                       # [1, S]

    P = jnp.sum(pe, axis=0).astype(jnp.float32)                 # [M, hd]
    neg_bias = jnp.where(mask_f32 > 0.5, 0.0, -1e30).astype(jnp.float32)

    qf = q.reshape(B * M, Din).astype(mm_dtype)
    kf = k.reshape(B * M, Din).astype(mm_dtype)
    vf = v.reshape(B * M, Din).astype(mm_dtype)

    kernel = functools.partial(_graph_attn_kernel, block_b, M, mm_dtype)

    def rows_spec(last):                         # per-batch-block activation rows
        return pl.BlockSpec((rows, last), lambda i, h: (i, 0))

    def head_spec(shape):                        # per-head parameter slice
        return pl.BlockSpec((1,) + shape, lambda i, h: (h, 0, 0))

    def rep_spec(shape):                         # replicated (constant block index)
        nd = len(shape)
        return pl.BlockSpec(shape, lambda i, h, _nd=nd: (0,) * _nd)

    in_specs = [
        rows_spec(Din), rows_spec(Din), rows_spec(Din),           # q, k, v rows
        pl.BlockSpec((block_b, 1, M), lambda i, h: (i, 0, 0)),    # mask bias
        rep_spec((M, hd)),                                        # P
        head_spec((Din, hd)), head_spec((1, hd)),                 # wq (scaled), bq
        head_spec((Din, hd)), head_spec((1, hd)),                 # wk, bk
        head_spec((Din, hd)), head_spec((1, hd)),                 # wv, bv
        head_spec((hd, S)),                                       # wo
        rep_spec((1, S)),                                         # bo
    ]
    out_spec = pl.BlockSpec((rows, S), lambda i, h: (i, 0))

    out = pl.pallas_call(
        kernel,
        out_shape=jax.ShapeDtypeStruct((B * M, S), out_dtype),
        grid_spec=pltpu.PrefetchScalarGridSpec(
            num_scalar_prefetch=0,
            grid=grid,
            in_specs=in_specs,
            out_specs=out_spec,
            scratch_shapes=[pltpu.VMEM((rows, S), jnp.float32)],
        ),
        compiler_params=pltpu.CompilerParams(
            dimension_semantics=("parallel", "arbitrary"),
            vmem_limit_bytes=48 * 1024 * 1024,   # explicit; headroom on v7x (64 MiB)
        ),
    )(qf, kf, vf, neg_bias, P, wq, bq, wk, bk, wv, bv, wo, bo)
    return out.reshape(B, M, S)


# ------------------------- pure-JAX reference (mirrors torch code) -----------
def _relative_attn_inner_ref(x, y, pos_embed):
    b, h, length, _ = x.shape
    xy = jnp.matmul(x, y)
    x_t_r = x.reshape(h * b, 1, length, x.shape[-1])
    x_tz = jnp.matmul(x_t_r, pos_embed).sum(axis=1)
    return xy + x_tz.reshape(b, h, length, -1)


def reference_forward(q, k, v, mask_bool, pe, params, num_heads, head_size):
    B, M, _ = q.shape
    S = num_heads * head_size
    kk = k @ params["wk"] + params["bk"]
    vv = v @ params["wv"] + params["bv"]
    qq = q @ params["wq"] + params["bq"]

    def split(x):
        return x.reshape(B, M, num_heads, head_size).transpose(0, 2, 1, 3)

    kk, vv, qq = split(kk), split(vv), split(qq)
    qq = qq / math.sqrt(head_size)

    scores = _relative_attn_inner_ref(qq, jnp.swapaxes(kk, -2, -1),
                                      jnp.swapaxes(pe, -2, -1))
    scores = jnp.where(mask_bool[:, None, :, :], scores, -jnp.inf)
    attn = jax.nn.softmax(scores, axis=-1)
    # dropout: identity in eval mode
    ctx = _relative_attn_inner_ref(attn, vv, pe)
    ctx = ctx.transpose(0, 2, 1, 3).reshape(B, M, S)
    return ctx @ params["wo"] + params["bo"]


# ----------------------------------- main ------------------------------------
if __name__ == "__main__":
    B, M, D_IN = 2, 8, 32
    NUM_HEADS, SIZE = 4, 32
    HEAD_SIZE = SIZE // NUM_HEADS

    key = jax.random.PRNGKey(0)
    keys = jax.random.split(key, 16)

    def linear_init(kw, kb, fan_in, fan_out):
        bound = 1.0 / math.sqrt(fan_in)
        w = jax.random.uniform(kw, (fan_in, fan_out), jnp.float32, -bound, bound)
        b = jax.random.uniform(kb, (1, fan_out), jnp.float32, -bound, bound)
        return w, b

    wq, bq = linear_init(keys[0], keys[1], D_IN, SIZE)
    wk, bk = linear_init(keys[2], keys[3], D_IN, SIZE)
    wv, bv = linear_init(keys[4], keys[5], D_IN, SIZE)
    wo, bo = linear_init(keys[6], keys[7], SIZE, SIZE)
    params = dict(wq=wq, bq=bq, wk=wk, bk=bk, wv=wv, bv=bv, wo=wo, bo=bo)

    q = jax.random.normal(keys[8], (B, M, D_IN), jnp.float32)
    k = jax.random.normal(keys[9], (B, M, D_IN), jnp.float32)
    v = jax.random.normal(keys[10], (B, M, D_IN), jnp.float32)
    pe = 0.1 * jax.random.normal(keys[11], (M, M, HEAD_SIZE), jnp.float32)

    lengths = jnp.array([8, 6], dtype=jnp.int32)
    mask_bool = (jnp.arange(M)[None, None, :] < lengths[:, None, None])  # [B,1,M]
    mask_f32 = mask_bool.astype(jnp.float32)

    out = multi_headed_graph_attention(q, k, v, mask_f32, pe, params,
                                       NUM_HEADS, HEAD_SIZE)
    out = jax.block_until_ready(out)

    ref = reference_forward(q, k, v, mask_bool, pe, params, NUM_HEADS, HEAD_SIZE)
    assert out.shape == (B, M, SIZE)
    # bf16 MXU inputs + approx reciprocal -> compare at bf16-level tolerance
    assert jnp.allclose(out, ref, atol=2e-2, rtol=2e-2), float(
        jnp.max(jnp.abs(out - ref)))

    print("KERNEL_OK")
</pallas_src>

<mosaic_0001>
module attributes {stable_mosaic.version = 11 : i64} {
  func.func @_graph_attn_kernel(%arg0: i32, %arg1: i32, %arg2: memref<8x32xbf16, #tpu.memory_space<vmem>>, %arg3: memref<8x32xbf16, #tpu.memory_space<vmem>>, %arg4: memref<8x32xbf16, #tpu.memory_space<vmem>>, %arg5: memref<1x1x8xf32, #tpu.memory_space<vmem>>, %arg6: memref<8x8xf32, #tpu.memory_space<vmem>>, %arg7: memref<1x32x8xbf16, #tpu.memory_space<vmem>>, %arg8: memref<1x1x8xf32, #tpu.memory_space<vmem>>, %arg9: memref<1x32x8xbf16, #tpu.memory_space<vmem>>, %arg10: memref<1x1x8xf32, #tpu.memory_space<vmem>>, %arg11: memref<1x32x8xbf16, #tpu.memory_space<vmem>>, %arg12: memref<1x1x8xf32, #tpu.memory_space<vmem>>, %arg13: memref<1x8x32xbf16, #tpu.memory_space<vmem>>, %arg14: memref<1x32xf32, #tpu.memory_space<vmem>>, %arg15: memref<8x32xf32, #tpu.memory_space<vmem>>, %arg16: memref<8x32xf32, #tpu.memory_space<vmem>>) attributes {dimension_semantics = [#tpu.dimension_semantics<parallel>, #tpu.dimension_semantics<arbitrary>], iteration_bounds = array<i64: 2, 4>, scalar_prefetch = 0 : i64, scratch_operands = 1 : i64, tpu.core_type = #tpu.core_type<tc>, window_params = [{transform_indices = @transform_0, window_bounds = array<i64: 8, 32>}, {transform_indices = @transform_1, window_bounds = array<i64: 8, 32>}, {transform_indices = @transform_2, window_bounds = array<i64: 8, 32>}, {transform_indices = @transform_3, window_bounds = array<i64: 1, 1, 8>}, {pipeline_mode = #tpu.pipeline_mode<synchronous>, transform_indices = @transform_4, window_bounds = array<i64: 8, 8>}, {transform_indices = @transform_5, window_bounds = array<i64: 1, 32, 8>}, {transform_indices = @transform_6, window_bounds = array<i64: 1, 1, 8>}, {transform_indices = @transform_7, window_bounds = array<i64: 1, 32, 8>}, {transform_indices = @transform_8, window_bounds = array<i64: 1, 1, 8>}, {transform_indices = @transform_9, window_bounds = array<i64: 1, 32, 8>}, {transform_indices = @transform_10, window_bounds = array<i64: 1, 1, 8>}, {transform_indices = @transform_11, window_bounds = array<i64: 1, 8, 32>}, {pipeline_mode = #tpu.pipeline_mode<synchronous>, transform_indices = @transform_12, window_bounds = array<i64: 1, 32>}, {transform_indices = @transform_13, window_bounds = array<i64: 8, 32>}]} {
    %c0 = arith.constant 0 : index
    %c0_0 = arith.constant 0 : index
    %0 = vector.load %arg2[%c0, %c0_0] : memref<8x32xbf16, #tpu.memory_space<vmem>>, vector<8x32xbf16>
    %c0_1 = arith.constant 0 : index
    %c0_2 = arith.constant 0 : index
    %c0_3 = arith.constant 0 : index
    %1 = vector.load %arg7[%c0_1, %c0_2, %c0_3] : memref<1x32x8xbf16, #tpu.memory_space<vmem>>, vector<1x32x8xbf16>
    %2 = vector.shape_cast %1 : vector<1x32x8xbf16> to vector<32x8xbf16>
    %cst = arith.constant dense<0.000000e+00> : vector<8x8xf32>
    %3 = tpu.matmul %0, %2, %cst {dimension_numbers = #tpu.dot_dimension_numbers<[1], [0], [0], [1], [0, 0, 1, 1], [], []>} : vector<8x32xbf16>, vector<32x8xbf16>, vector<8x8xf32> -> vector<8x8xf32>
    %c0_4 = arith.constant 0 : index
    %c0_5 = arith.constant 0 : index
    %c0_6 = arith.constant 0 : index
    %4 = vector.load %arg8[%c0_4, %c0_5, %c0_6] : memref<1x1x8xf32, #tpu.memory_space<vmem>>, vector<1x1x8xf32>
    %5 = vector.shape_cast %4 : vector<1x1x8xf32> to vector<1x8xf32>
    %6 = vector.broadcast %5 : vector<1x8xf32> to vector<8x8xf32>
    %7 = arith.addf %3, %6 : vector<8x8xf32>
    %c0_7 = arith.constant 0 : index
    %c0_8 = arith.constant 0 : index
    %8 = vector.load %arg3[%c0_7, %c0_8] : memref<8x32xbf16, #tpu.memory_space<vmem>>, vector<8x32xbf16>
    %c0_9 = arith.constant 0 : index
    %c0_10 = arith.constant 0 : index
    %c0_11 = arith.constant 0 : index
    %9 = vector.load %arg9[%c0_9, %c0_10, %c0_11] : memref<1x32x8xbf16, #tpu.memory_space<vmem>>, vector<1x32x8xbf16>
    %10 = vector.shape_cast %9 : vector<1x32x8xbf16> to vector<32x8xbf16>
    %cst_12 = arith.constant dense<0.000000e+00> : vector<8x8xf32>
    %11 = tpu.matmul %8, %10, %cst_12 {dimension_numbers = #tpu.dot_dimension_numbers<[1], [0], [0], [1], [0, 0, 1, 1], [], []>} : vector<8x32xbf16>, vector<32x8xbf16>, vector<8x8xf32> -> vector<8x8xf32>
    %c0_13 = arith.constant 0 : index
    %c0_14 = arith.constant 0 : index
    %c0_15 = arith.constant 0 : index
    %12 = vector.load %arg10[%c0_13, %c0_14, %c0_15] : memref<1x1x8xf32, #tpu.memory_space<vmem>>, vector<1x1x8xf32>
    %13 = vector.shape_cast %12 : vector<1x1x8xf32> to vector<1x8xf32>
    %14 = vector.broadcast %13 : vector<1x8xf32> to vector<8x8xf32>
    %15 = arith.addf %11, %14 : vector<8x8xf32>
    %c0_16 = arith.constant 0 : index
    %c0_17 = arith.constant 0 : index
    %16 = vector.load %arg4[%c0_16, %c0_17] : memref<8x32xbf16, #tpu.memory_space<vmem>>, vector<8x32xbf16>
    %c0_18 = arith.constant 0 : index
    %c0_19 = arith.constant 0 : index
    %c0_20 = arith.constant 0 : index
    %17 = vector.load %arg11[%c0_18, %c0_19, %c0_20] : memref<1x32x8xbf16, #tpu.memory_space<vmem>>, vector<1x32x8xbf16>
    %18 = vector.shape_cast %17 : vector<1x32x8xbf16> to vector<32x8xbf16>
    %cst_21 = arith.constant dense<0.000000e+00> : vector<8x8xf32>
    %19 = tpu.matmul %16, %18, %cst_21 {dimension_numbers = #tpu.dot_dimension_numbers<[1], [0], [0], [1], [0, 0, 1, 1], [], []>} : vector<8x32xbf16>, vector<32x8xbf16>, vector<8x8xf32> -> vector<8x8xf32>
    %c0_22 = arith.constant 0 : index
    %c0_23 = arith.constant 0 : index
    %c0_24 = arith.constant 0 : index
    %20 = vector.load %arg12[%c0_22, %c0_23, %c0_24] : memref<1x1x8xf32, #tpu.memory_space<vmem>>, vector<1x1x8xf32>
    %21 = vector.shape_cast %20 : vector<1x1x8xf32> to vector<1x8xf32>
    %22 = vector.broadcast %21 : vector<1x8xf32> to vector<8x8xf32>
    %23 = arith.addf %19, %22 : vector<8x8xf32>
    %c0_25 = arith.constant 0 : index
    %c0_26 = arith.constant 0 : index
    %24 = vector.load %arg6[%c0_25, %c0_26] : memref<8x8xf32, #tpu.memory_space<vmem>>, vector<8x8xf32>
    %25 = vector.shape_cast %7 : vector<8x8xf32> to vector<1x8x8xf32>
    %26 = arith.truncf %25 : vector<1x8x8xf32> to vector<1x8x8xbf16>
    %27 = vector.shape_cast %15 : vector<8x8xf32> to vector<1x8x8xf32>
    %28 = vector.shape_cast %24 : vector<8x8xf32> to vector<1x8x8xf32>
    %29 = arith.addf %27, %28 : vector<1x8x8xf32>
    %30 = arith.truncf %29 : vector<1x8x8xf32> to vector<1x8x8xbf16>
    %31 = vector.shape_cast %23 : vector<8x8xf32> to vector<1x8x8xf32>
    %32 = vector.shape_cast %24 : vector<8x8xf32> to vector<1x8x8xf32>
    %33 = arith.addf %31, %32 : vector<1x8x8xf32>
    %34 = arith.truncf %33 : vector<1x8x8xf32> to vector<1x8x8xbf16>
    "tpu.trace_start"() <{level = 10 : i32, message = "bqd,bkd->bqk"}> : () -> ()
    %cst_27 = arith.constant dense<0.000000e+00> : vector<1x8x8xf32>
    %35 = tpu.matmul %26, %30, %cst_27 {dimension_numbers = #tpu.dot_dimension_numbers<[2], [2], [1], [1], [0, 0, 0, 1, 1, 1], [0], [0]>} : vector<1x8x8xbf16>, vector<1x8x8xbf16>, vector<1x8x8xf32> -> vector<1x8x8xf32>
    "tpu.trace_stop"() : () -> ()
    %c0_28 = arith.constant 0 : index
    %c0_29 = arith.constant 0 : index
    %c0_30 = arith.constant 0 : index
    %36 = vector.load %arg5[%c0_28, %c0_29, %c0_30] : memref<1x1x8xf32, #tpu.memory_space<vmem>>, vector<1x1x8xf32>
    %37 = vector.broadcast %36 : vector<1x1x8xf32> to vector<1x8x8xf32>
    %38 = arith.addf %35, %37 : vector<1x8x8xf32>
    %cst_31 = arith.constant dense<0xFF800000> : vector<1x8xf32>
    %39 = vector.multi_reduction <maximumf>, %38, %cst_31 [2] : vector<1x8x8xf32> to vector<1x8xf32>
    %40 = vector.shape_cast %39 : vector<1x8xf32> to vector<1x8x1xf32>
    %41 = vector.broadcast %40 : vector<1x8x1xf32> to vector<1x8x8xf32>
    %42 = arith.subf %38, %41 : vector<1x8x8xf32>
    %43 = math.exp %42 : vector<1x8x8xf32>
    %cst_32 = arith.constant dense<0.000000e+00> : vector<1x8xf32>
    %44 = vector.multi_reduction <add>, %43, %cst_32 [2] : vector<1x8x8xf32> to vector<1x8xf32>
    %45 = vector.shape_cast %44 : vector<1x8xf32> to vector<1x8x1xf32>
    %46 = tpu.reciprocal %45 {approx = true} : vector<1x8x1xf32> -> vector<1x8x1xf32>
    %47 = vector.broadcast %46 : vector<1x8x1xf32> to vector<1x8x8xf32>
    %48 = arith.mulf %43, %47 : vector<1x8x8xf32>
    %49 = arith.truncf %48 : vector<1x8x8xf32> to vector<1x8x8xbf16>
    "tpu.trace_start"() <{level = 10 : i32, message = "bqk,bkd->bqd"}> : () -> ()
    %cst_33 = arith.constant dense<0.000000e+00> : vector<1x8x8xf32>
    %50 = tpu.matmul %49, %34, %cst_33 {dimension_numbers = #tpu.dot_dimension_numbers<[2], [1], [1], [2], [0, 0, 0, 1, 1, 2], [0], [0]>} : vector<1x8x8xbf16>, vector<1x8x8xbf16>, vector<1x8x8xf32> -> vector<1x8x8xf32>
    %c0_i32 = arith.constant 0 : i32
    "tpu.trace_stop"() : () -> ()
    %51 = arith.cmpi eq, %arg1, %c0_i32 : i32
    %52 = arith.extui %51 : i1 to i32
    %c0_i32_34 = arith.constant 0 : i32
    %53 = arith.cmpi ne, %52, %c0_i32_34 : i32
    scf.if %53 {
      %cst_44 = arith.constant 0.000000e+00 : f32
      %65 = vector.broadcast %cst_44 : f32 to vector<8x32xf32>
      %c0_45 = arith.constant 0 : index
      %c0_46 = arith.constant 0 : index
      %66 = vector.load %arg16[%c0_45, %c0_46] : memref<8x32xf32, #tpu.memory_space<vmem>>, vector<8x32xf32>
      tpu.vector_store %arg16[%c0_45, %c0_46], %65 {strides = array<i32>} : memref<8x32xf32, #tpu.memory_space<vmem>>, vector<8x32xf32>,
    } else {
    }
    %c0_35 = arith.constant 0 : index
    %c0_36 = arith.constant 0 : index
    %54 = vector.load %arg16[%c0_35, %c0_36] : memref<8x32xf32, #tpu.memory_space<vmem>>, vector<8x32xf32>
    %55 = vector.shape_cast %50 : vector<1x8x8xf32> to vector<8x8xf32>
    %56 = arith.truncf %55 : vector<8x8xf32> to vector<8x8xbf16>
    %c0_37 = arith.constant 0 : index
    %c0_38 = arith.constant 0 : index
    %c0_39 = arith.constant 0 : index
    %57 = vector.load %arg13[%c0_37, %c0_38, %c0_39] : memref<1x8x32xbf16, #tpu.memory_space<vmem>>, vector<1x8x32xbf16>
    %58 = vector.shape_cast %57 : vector<1x8x32xbf16> to vector<8x32xbf16>
    %cst_40 = arith.constant dense<0.000000e+00> : vector<8x32xf32>
    %59 = tpu.matmul %56, %58, %cst_40 {dimension_numbers = #tpu.dot_dimension_numbers<[1], [0], [0], [1], [0, 0, 1, 1], [], []>} : vector<8x8xbf16>, vector<8x32xbf16>, vector<8x32xf32> -> vector<8x32xf32>
    %60 = arith.addf %54, %59 : vector<8x32xf32>
    %c0_41 = arith.constant 0 : index
    %c0_42 = arith.constant 0 : index
    %61 = vector.load %arg16[%c0_41, %c0_42] : memref<8x32xf32, #tpu.memory_space<vmem>>, vector<8x32xf32>
    tpu.vector_store %arg16[%c0_41, %c0_42], %60 {strides = array<i32>} : memref<8x32xf32, #tpu.memory_space<vmem>>, vector<8x32xf32>,
    %c3_i32 = arith.constant 3 : i32
    %62 = arith.cmpi eq, %arg1, %c3_i32 : i32
    %63 = arith.extui %62 : i1 to i32
    %c0_i32_43 = arith.constant 0 : i32
    %64 = arith.cmpi ne, %63, %c0_i32_43 : i32
    scf.if %64 {
      %c0_44 = arith.constant 0 : index
      %c0_45 = arith.constant 0 : index
      %65 = vector.load %arg16[%c0_44, %c0_45] : memref<8x32xf32, #tpu.memory_space<vmem>>, vector<8x32xf32>
      %c0_46 = arith.constant 0 : index
      %c0_47 = arith.constant 0 : index
      %66 = vector.load %arg14[%c0_46, %c0_47] : memref<1x32xf32, #tpu.memory_space<vmem>>, vector<1x32xf32>
      %67 = vector.broadcast %66 : vector<1x32xf32> to vector<8x32xf32>
      %68 = arith.addf %65, %67 : vector<8x32xf32>
      %c0_48 = arith.constant 0 : index
      %c0_49 = arith.constant 0 : index
      %69 = vector.load %arg15[%c0_48, %c0_49] : memref<8x32xf32, #tpu.memory_space<vmem>>, vector<8x32xf32>
      tpu.vector_store %arg15[%c0_48, %c0_49], %68 {strides = array<i32>} : memref<8x32xf32, #tpu.memory_space<vmem>>, vector<8x32xf32>,
    } else {
    }
    return
  }
  func.func @transform_0(%arg0: i32, %arg1: i32) -> (i32, i32) {
    %c0_i32 = arith.constant 0 : i32
    %c0_i32_0 = arith.constant 0 : i32
    return %arg0, %c0_i32 : i32, i32
  }
  func.func @transform_1(%arg0: i32, %arg1: i32) -> (i32, i32) {
    %c0_i32 = arith.constant 0 : i32
    %c0_i32_0 = arith.constant 0 : i32
    return %arg0, %c0_i32 : i32, i32
  }
  func.func @transform_2(%arg0: i32, %arg1: i32) -> (i32, i32) {
    %c0_i32 = arith.constant 0 : i32
    %c0_i32_0 = arith.constant 0 : i32
    return %arg0, %c0_i32 : i32, i32
  }
  func.func @transform_3(%arg0: i32, %arg1: i32) -> (i32, i32, i32) {
    %c0_i32 = arith.constant 0 : i32
    %c0_i32_0 = arith.constant 0 : i32
    %c0_i32_1 = arith.constant 0 : i32
    return %arg0, %c0_i32, %c0_i32_0 : i32, i32, i32
  }
  func.func @transform_4(%arg0: i32, %arg1: i32) -> (i32, i32) {
    %c0_i32 = arith.constant 0 : i32
    %c0_i32_0 = arith.constant 0 : i32
    %c0_i32_1 = arith.constant 0 : i32
    return %c0_i32, %c0_i32_0 : i32, i32
  }
  func.func @transform_5(%arg0: i32, %arg1: i32) -> (i32, i32, i32) {
    %c0_i32 = arith.constant 0 : i32
    %c0_i32_0 = arith.constant 0 : i32
    %c0_i32_1 = arith.constant 0 : i32
    return %arg1, %c0_i32, %c0_i32_0 : i32, i32, i32
  }
  func.func @transform_6(%arg0: i32, %arg1: i32) -> (i32, i32, i32) {
    %c0_i32 = arith.constant 0 : i32
    %c0_i32_0 = arith.constant 0 : i32
    %c0_i32_1 = arith.constant 0 : i32
    return %arg1, %c0_i32, %c0_i32_0 : i32, i32, i32
  }
  func.func @transform_7(%arg0: i32, %arg1: i32) -> (i32, i32, i32) {
    %c0_i32 = arith.constant 0 : i32
    %c0_i32_0 = arith.constant 0 : i32
    %c0_i32_1 = arith.constant 0 : i32
    return %arg1, %c0_i32, %c0_i32_0 : i32, i32, i32
  }
  func.func @transform_8(%arg0: i32, %arg1: i32) -> (i32, i32, i32) {
    %c0_i32 = arith.constant 0 : i32
    %c0_i32_0 = arith.constant 0 : i32
    %c0_i32_1 = arith.constant 0 : i32
    return %arg1, %c0_i32, %c0_i32_0 : i32, i32, i32
  }
  func.func @transform_9(%arg0: i32, %arg1: i32) -> (i32, i32, i32) {
    %c0_i32 = arith.constant 0 : i32
    %c0_i32_0 = arith.constant 0 : i32
    %c0_i32_1 = arith.constant 0 : i32
    return %arg1, %c0_i32, %c0_i32_0 : i32, i32, i32
  }
  func.func @transform_10(%arg0: i32, %arg1: i32) -> (i32, i32, i32) {
    %c0_i32 = arith.constant 0 : i32
    %c0_i32_0 = arith.constant 0 : i32
    %c0_i32_1 = arith.constant 0 : i32
    return %arg1, %c0_i32, %c0_i32_0 : i32, i32, i32
  }
  func.func @transform_11(%arg0: i32, %arg1: i32) -> (i32, i32, i32) {
    %c0_i32 = arith.constant 0 : i32
    %c0_i32_0 = arith.constant 0 : i32
    %c0_i32_1 = arith.constant 0 : i32
    return %arg1, %c0_i32, %c0_i32_0 : i32, i32, i32
  }
  func.func @transform_12(%arg0: i32, %arg1: i32) -> (i32, i32) {
    %c0_i32 = arith.constant 0 : i32
    %c0_i32_0 = arith.constant 0 : i32
    %c0_i32_1 = arith.constant 0 : i32
    return %c0_i32, %c0_i32_0 : i32, i32
  }
  func.func @transform_13(%arg0: i32, %arg1: i32) -> (i32, i32) {
    %c0_i32 = arith.constant 0 : i32
    %c0_i32_0 = arith.constant 0 : i32
    return %arg0, %c0_i32 : i32, i32
  }
}

</mosaic_0001>

<bundles_post_ra>
// kernel: tpu_custom_call.1
= control target key start
LH: loop header
LB: loop body
LE: loop exit
PB: predicated region body
PF: predicated region fallthrough
CT: control target
= control target key end

     0   :  { %s1778_s0 = inlined_call_operand.vmem [shape: bf16[16,32], index: 0, kind: input, shape index: {}]   ;;  %s1779_s1 = inlined_call_operand.vmem [shape: bf16[16,32], index: 1, kind: input, shape index: {}]   ;;  %s1780_s2 = inlined_call_operand.vmem [shape: bf16[16,32], index: 2, kind: input, shape index: {}]   ;;  %s1781_s3 = inlined_call_operand.vmem [shape: f32[2,1,8], index: 3, kind: input, shape index: {}]   ;;  %s1782_s4 = inlined_call_operand.vmem [shape: f32[8,8], index: 4, kind: input, shape index: {}]   ;;  %s1783_s5 = inlined_call_operand.vmem [shape: bf16[4,32,8], index: 5, kind: input, shape index: {}]   ;;  %s1784_s6 = inlined_call_operand.vmem [shape: f32[4,1,8], index: 6, kind: input, shape index: {}]   ;;  %s1785_s7 = inlined_call_operand.vmem [shape: bf16[4,32,8], index: 7, kind: input, shape index: {}]   ;;  %s1786_s8 = inlined_call_operand.vmem [shape: f32[4,1,8], index: 8, kind: input, shape index: {}]   ;;  %s1787_s9 = inlined_call_operand.vmem [shape: bf16[4,32,8], index: 9, kind: input, shape index: {}]   ;;  %s1788_s10 = inlined_call_operand.vmem [shape: f32[4,1,8], index: 10, kind: input, shape index: {}]   ;;  %s1789_s11 = inlined_call_operand.vmem [shape: bf16[4,8,32], index: 11, kind: input, shape index: {}]   ;;  %s1790_s12 = inlined_call_operand.vmem [shape: f32[1,32], index: 12, kind: input, shape index: {}]   ;;  %s1791_s13 = inlined_call_operand.hbm [shape: f32[16,32], index: 13, kind: output, shape index: {}]  }
   0x1   :  { %1805 = sst [smem:[#allocation17_spill]] %s1791_s13 }
   0x2   :  { %18 = vsyncpa [#allocation4], 0 }
   0x3   :  { %20 = vsyncpa [#allocation4 + $0x1], 0  ;;  %s1550_s25 = smov 0   ;;  %s1552_s26 = smov 0  }
   0x4   :  { %s1554_s27 = smov 0   ;;  %s1556_s28 = smov 0  }
   0x5   :  { %s1558_s29 = smov 0   ;;  %s1560_s30 = smov 0  }
   0x6   :  { %s1562_s14 = smov 0   ;;  %s1564_s15 = smov 0  }
   0x7 LB: > { %1806 = sst [smem:[#allocation6_spill]] %s1446_s25  ;;  %s1199_s16 = sadd.s32 4294967295, %s1474_s15   ;;  %s1474_s15 = sphi %s1564_s15, %s26_s15   ;;  %s1470_s14 = sphi %s1562_s14, %s1833_s14   ;;  %s1466_s30 = sphi %s1560_s30, %s1832_s30   ;;  %s1462_s29 = sphi %s1558_s29, %s1831_s29   ;;  %s1458_s28 = sphi %s1556_s28, %s1830_s28   ;;  %s1454_s27 = sphi %s1554_s27, %s1829_s27   ;;  %s1450_s26 = sphi %s1552_s26, %s1828_s26   ;;  %s1446_s25 = sphi %s1550_s25, %s1827_s25  }
   0x8   : > { %1807 = sst [smem:[#allocation7_spill]] %s1450_s26  ;;  %s1200_s17 = sadd.s32 4294967294, %s1474_s15  }
   0x9   : > { %1808 = sst [smem:[#allocation8_spill]] %s1454_s27  ;;  %s35_s18 = sadd.s32 1, %s1466_s30 }
   0xa   : > { %1809 = sst [smem:[#allocation9_spill]] %s1466_s30  ;;  %p36_p0 = scmp.ge.s32.totalorder %s35_s18, 4 }
   0xb   : > { %1810 = sst [smem:[#allocation10_spill]] %s1470_s14  ;;  %s38_s19 = sadd.s32 1, %s1470_s14 }
   0xc   : > { %1811 = sst [smem:[#allocation11_spill]] %s1474_s15  ;;  %p383_p1 = scmp.ne.s32.totalorder %s1454_s27, %s1450_s26 }
   0xd   : > { %p384_p2 = scmp.eq.s32.totalorder %s1199_s16, 7  ;;  %s1835_s18 = smov (%p36_p0, %s35_s18), 0 }
   0xe   : > { %1812 = sst [smem:[#allocation12_spill]] %s1835_s18  ;;  %s1837_s19 = smov (!%p36_p0, %s38_s19), %s1470_s14 }
   0xf   : > { %p1599_p3 = por %p384_p2, %p383_p1  ;;  %p389_p4 = scmp.ne.s32.totalorder %s1450_s26, %s1446_s25 }
  0x10   : > { %p40_p5 = scmp.ge.s32.totalorder %s1837_s19, 2  ;;  %p390_p6 = scmp.eq.s32.totalorder %s1200_s17, 7 }
  0x11   : > { %s1813_s20 = scalar_select %p1599_p3, 1, 0 }
  0x12   : > { %p1203_p7 = scmp.ge.s32.totalorder %s1474_s15, 1  ;;  %p490_p8 = scmp.lt.s32.totalorder %s1474_s15, 9 }
  0x13   : > { %1814 = sst [smem:[#allocation13_spill]] %s1813_s20  ;;  %s1839_s19 = smov (%p40_p5, %s1837_s19), 0 }
  0x14   : > { %1815 = sst [smem:[#allocation14_spill]] %s1839_s19  ;;  %p1609_p9 = por %p390_p6, %p389_p4 }
  0x15   : > { %p491_p10 = pnand %p1203_p7, %p490_p8  ;;  %s370_s22 = ssub.s32 %s1470_s14, %s1839_s19 }
  0x16   : > { %s1816_s21 = scalar_select %p1609_p9, 1, 0 }
  0x17   : > { %s373_s23 = sadd.s32 1, %s1454_s27  ;;  %p371_p11 = scmp.eq.s32.totalorder %s370_s22, 0 }
  0x18   : > { %1817 = sst [smem:[#allocation15_spill]] %s1816_s21  ;;  %494 = sbr.rel (%p491_p10) target bundleno = 1194 (0x4aa), region = 72 }
  0x19   : > { %s1617_s24 = scalar_select %p371_p11, %s1454_s27, %s373_s23  }
  0x1a   : > { %p587_p12 = scmp.lt.s32.totalorder (!%p491_p10), %s1458_s28, 3  ;;  %s1794_s16 = sand.u32 (!%p491_p10), 1, %s1450_s26  }
  0x1b   : > { %1818 = sst [smem:[#allocation16_spill]] %s1617_s24  ;;  %s1624_s17 = sshll.u32 (!%p491_p10), %s1794_s16, 3 }
  0x1c   : > { %p572_p13 = scmp.lt.s32.totalorder (!%p491_p10), %s1462_s29, 1  ;;  %p1230_p0 = scmp.ne.s32.totalorder (!%p491_p10), %s1458_s28, 0 }
  0x1d   : > { %v1476_v0 = vmov 0.0   ;;  %s1628_s22 = scalar_select %p587_p12, %s1458_s28, 3  ;;  %vm1477_vm0 = vmmov 0   ;;  %vm640_vm1 = vcmask 261120   ;;  %v818_v9 = vld [vmem:[%s1782_s4] sm:$0xff]  ;;  %vm831_vm2 = vcmask 64512  }
  0x1e   : > { %1264 = vmatprep.subr.bf16.mxu1 %v1476_v0  ;;  %1256 = vmatprep.subr.bf16.mxu0 %v1476_v0  ;;  %s1649_s13 = scalar_select %p572_p13, %s1462_s29, 1  ;;  %vm893_vm3 = vcmask 1043456  }
  0x1f   : > { %1268 = vmatprep.mubr.msk.bf16.mxu1 %vm1477_vm0, %v1476_v0  ;;  %1260 = vmatprep.mubr.msk.bf16.mxu0 %vm1477_vm0, %v1476_v0  ;;  %s1238_s23 = sshll.u32 %s1628_s22, 4  ;;  %s1214_s19 = sshll.u32 %s1628_s22, 2 }
  0x20   : > { %s599_s16 = scalar_lea.vmem %s1785_s7, %s1238_s23  ;;  %s1643_s27 = scalar_lea.vmem %s1789_s11, %s1214_s19 }
  0x21   : > { %v1372_v1 = vld [vmem:[%s599_s16 + $0x8] sm:$0xff]   ;;  %s591_s15 = scalar_lea.vmem %s1783_s5, %s1238_s23  ;;  %v1373_v2 = vld [vmem:[%s599_s16] sm:$0xff]   ;;  %s1654_s14 = scalar_lea.vmem %s1787_s9, %s1238_s23 }
  0x22   : > { %1265 = vmatpush3.bf16.msra.mxu1 %v1372_v1  ;;  %v1374_v3 = vld [vmem:[%s591_s15 + $0x8] sm:$0xff]   ;;  %s1658_s30 = sshll.u32 %s1649_s13, 2  ;;  %v1375_v4 = vld [vmem:[%s591_s15] sm:$0xff]   ;;  %s602_s16 = scalar_lea.vmem %s1786_s8, %s1628_s22 }
  0x23   : > { %1266 = vmatprep.subr.bf16.mxu1 %v1476_v0  ;;  %1257 = vmatpush3.bf16.msra.mxu0 %v1374_v3  ;;  %s579_s19 = scalar_lea.vmem %s1779_s1, %s1658_s30  ;;  %s575_s26 = scalar_lea.vmem %s1778_s0, %s1658_s30  ;;  %v1219_v7 = vld [vmem:[%s602_s16] ss:$0 sm:$0xff]  ;;  %v1376_v24 = vld [vmem:[%s1654_s14 + $0x8] sm:$0xff]  }
  0x24   : > { %1258 = vmatprep.subr.bf16.mxu0 %v1476_v0  ;;  %v684_v5 = vld [vmem:[%s579_s19] sm:$0xf]  ;;  %s594_s21 = scalar_lea.vmem %s1784_s6, %s1628_s22  ;;  %s583_s15 = scalar_lea.vmem %s1780_s2, %s1658_s30 }
  0x25   : > { %v616_v6 = vld [vmem:[%s575_s26] sm:$0xf]  ;;  %s586_s23 = scalar_lea.vmem %s1781_s3, %s1649_s13  ;;  %s610_s30 = scalar_lea.vmem %s1788_s10, %s1628_s22 }
  0x26   : > { %1267 = vmatpush3.bf16.msra.mxu1 %v1373_v2  ;;  %v1215_v15 = vld [vmem:[%s594_s21] ss:$0 sm:$0xff]  ;;  %s571_s22 = scalar_lea.vmem [#allocation3], %s1624_s17 }
  0x27   : > { %1280 = vmatprep.subr.bf16.mxu1 %v1476_v0  ;;  %1259 = vmatpush3.bf16.msra.mxu0 %v1375_v4  ;;  %v1377_v25 = vld [vmem:[%s1654_s14] sm:$0xff]  }
  0x28   : > { %1272 = vmatprep.subr.bf16.mxu0 %v1476_v0  ;;  %v751_v26 = vld [vmem:[%s583_s15] sm:$0xf] }
  0x29   : > { %1269 = vmatmul.mubr.msk.bf16.vlgmr.msra.gmra.mxu1 %vm640_vm1, %v684_v5  ;;  %v1227_v27 = vld [vmem:[%s586_s23] ss:$0 sm:$0xff] }
  0x2a   : > { %1282 = vmatprep.mubr.msk.bf16.mxu1 %vm1477_vm0, %v1476_v0  ;;  %1261 = vmatmul.mubr.msk.bf16.vlgmr.msra.gmra.mxu0 %vm640_vm1, %v616_v6  ;;  %v1223_v41 = vld [vmem:[%s610_s30] ss:$0 sm:$0xff] }
  0x2b   : > { %1276 = vmatprep.mubr.msk.bf16.mxu0 %vm1477_vm0, %v1476_v0  ;;  %1273 = vmatpush3.bf16.msra.mxu0 %v1376_v24 }
  0x2c   : > { %1274 = vmatprep.subr.bf16.mxu0 %v1476_v0 }
  0x2f   : > { %1275 = vmatpush3.bf16.msra.mxu0 %v1377_v25 }
  0x30   : > { %1286 = vmatprep.subr.bf16.mxu0 %v1476_v0 }
  0x32   : > { %1277 = vmatmul.mubr.msk.bf16.vlgmr.msra.gmra.mxu0 %vm640_vm1, %v751_v26 }
  0x33   : > { %1288 = vmatprep.mubr.msk.bf16.mxu0 %vm1477_vm0, %v1476_v0 }
  0xe9   : > { %v745_v8 = vpop.f32.mrf.mxu1 }
  0xea   : > { %v746_v10 = vadd.f32 %v1219_v7, %v745_v8  ;;  %v678_v12 = vpop.f32.mrf.mxu0 }
  0xeb   : > { %v1270_v11 = vpop.f32.mrf.mxu1  ;;  %v679_v20 = vadd.f32 %v1215_v15, %v678_v12 }
  0xec   : > { %v820_v13 = vadd.f32 %v818_v9, %v746_v10  ;;  %v1262_v16 = vpop.f32.mrf.mxu0 }
  0xed   : > { %v748_v14 = vpop.f32.mrf.mxu1  ;;  %v819_v23 = vpack.c.bf16 %v679_v20, %v679_v20 }
  0xee   : > { %v821_v17 = vpack.c.bf16 %v820_v13, %v820_v13  ;;  %v681_v19 = vpop.f32.mrf.mxu0 }
  0xef   : > { %v1271_v18 = vpop.f32.mrf.mxu1 }
  0xf0   : > { %v836_v21 = vsel %vm831_vm2, %v821_v17, 0  ;;  %v1263_v22 = vpop.f32.mrf.mxu0 }
  0xf1   : > { %1281 = vmatpush3.bf16.xpose.msra.mxu1 %v836_v21 }
  0xf2   : > { %v812_v34 = vpop.f32.mrf.mxu0 }
  0xf3   : > { %v813_v44 = vadd.f32 %v1223_v41, %v812_v34 }
  0xf4   : > { %v1278_v35 = vpop.f32.mrf.mxu0 }
  0xf5   : > { %v822_v45 = vadd.f32 %v818_v9, %v813_v44 }
  0xf6   : > { %v815_v36 = vpop.f32.mrf.mxu0 }
  0xf7   : > { %v823_v46 = vpack.c.bf16 %v822_v45, %v822_v45 }
  0xf8   : > { %1283 = vmatmul.mubr.msk.bf16.vlgmr.msra.gmra.mxu1 %vm831_vm2, %v819_v23  ;;  %v1279_v37 = vpop.f32.mrf.mxu0 }
  0xf9   : > { %v895_v47 = vsel %vm893_vm3, %v823_v46, 0 }
  0xfa   : > { %1287 = vmatpush3.bf16.msra.mxu0 %v895_v47 }
 0x1b8   : > { %v872_v28 = vpop.f32.mrf.mxu1 }
 0x1b9   : > { %v873_v29 = vadd.f32 %v1227_v27, %v872_v28 }
 0x1ba   : > { %v1284_v30 = vpop.f32.mrf.mxu1 }
 0x1bb   : > { %v878_v31 = vsel %vm831_vm2, %v873_v29, -inf }
 0x1bc   : > { %879 = vmax.xlane.f32.xlu0 %v878_v31  ;;  %v875_v32 = vpop.f32.mrf.mxu1 }
 0x1be   : > { %v1285_v33 = vpop.f32.mrf.mxu1 }
 0x245   : > { %v880_v38 = vpop.xlane.xlu0 %879 }
 0x246   : > { %v881_v39 = vsub.f32 %v873_v29, %v880_v38 }
 0x248   : > { %v882_v40 = vmul.f32 1.442695, %v881_v39 }
 0x24a   : > { %1378 = vpow2.f32 %v882_v40 }
 0x257   : > { %v1379_v42 = vpop.eup %1378 }
 0x258   : > { %v884_v43 = vsel %vm831_vm2, %v1379_v42, 0.0 }
 0x259   : > { %885 = vadd.xlane.f32.xlu0 %v884_v43 }
 0x2e2   : > { %v886_v48 = vpop.xlane.xlu0 %885 }
 0x2e3   : > { %1380 = vrcp.f32 %v886_v48 }
 0x2f0   : > { %v1381_v49 = vpop.eup %1380 }
 0x2f1   : > { %v888_v50 = vmul.f32 %v1381_v49, %v1379_v42 }
 0x2f3   : > { %v889_v51 = vpack.c.bf16 %v888_v50, %v888_v50 }
 0x2f5   : > { %1289 = vmatmul.mubr.msk.bf16.vlgmr.msra.gmra.mxu0 %vm831_vm2, %v889_v51 }
 0x3b5   : > { %v931_v52 = vpop.f32.mrf.mxu0 }
 0x3b7   : > { %v1290_v53 = vpop.f32.mrf.mxu0  ;;  %940 = sbr.rel (%p1230_p0) target bundleno = 958 (0x3be), region = 76 }
 0x3b9   : > { %v934_v54 = vpop.f32.mrf.mxu0 }
 0x3bb   : > { %v1291_v55 = vpop.f32.mrf.mxu0 }
 0x3bc   : > { %v1478_v56 = vmov 0.0  }
 0x3bd   : > { %941 = vst.msk [vmem:[#allocation2] sm:$0xff] %vm640_vm1, %v1478_v56 }
 0x3be PF: > { %1292 = vmatprep.subr.bf16.mxu1 %v1476_v0  ;;  %v944_v57 = vld [vmem:[%s1643_s27] sm:$0xf]  ;;  %1294 = vmatprep.mubr.msk.bf16.mxu1 %vm1477_vm0, %v1476_v0  ;;  %v943_v59 = vpack.c.bf16 %v931_v52, %v931_v52  ;;  %p1232_p1 = scmp.ne.s32.totalorder %s1458_s28, 3 }
 0x3bf   : > { %v949_v58 = vsel %vm893_vm3, %v944_v57, 0 }
 0x3c0   : > { %1293 = vmatpush3.bf16.msra.mxu1 %v949_v58 }
 0x3c3   : > { %1295 = vmatmul.mubr.msk.bf16.vlgmr.msra.gmra.mxu1 %vm831_vm2, %v943_v59 }
 0x3c4   : > { %v942_v60 = vld [vmem:[#allocation2] sm:$0xff] }
 0x483   : > { %v985_v61 = vpop.f32.mrf.mxu1 }
 0x484   : > { %v991_v62 = vadd.f32 %v985_v61, %v942_v60 }
 0x485   : > { %v1296_v63 = vpop.f32.mrf.mxu1  ;;  %996 = sbr.rel (%p1232_p1) target bundleno = 1169 (0x491), region = 80 }
 0x486   : > { %992 = vst.msk [vmem:[#allocation2] sm:$0xff] %vm640_vm1, %v991_v62 }
 0x487   : > { %v988_v1 = vpop.f32.mrf.mxu1 }
 0x489   : > { %v1297_v2 = vpop.f32.mrf.mxu1 }
 0x48a   : > { %v1233_v0 = vld [vmem:[%s1790_s12] ss:$0 sm:$0xff] }
 0x48d   : > { %v997_v3 = vld [vmem:[#allocation2] sm:$0xff] }
 0x48e   : > { %v1005_v4 = vadd.f32 %v1233_v0, %v997_v3 }
 0x490   : > { %1006 = vst.msk [vmem:[%s571_s22] sm:$0xff] %vm640_vm1, %v1005_v4 }
 0x491 PF: > { %s1819_s18 = sld [smem:[#allocation7_spill]]  ;;  %s1235_s21 = sshll.u32 %s1462_s29, 7 }
 0x492   : > { %s1821_s28 = sld [smem:[#allocation17_spill]]  ;;  %s1021_s16 = sshll.u32 %s571_s22, 4  ;;  %s1022_s16 = int_to_ptr.vmem [resolvable:$true] %s1021_s16 }
 0x493   : > { %s1382_s13 = scalar_lea.vmem %s1022_s16, 128  ;;  %s1479_s30 = smov [#allocation3]  }
 0x494   : > { %p1383_p2 = scmp.ne.s32.totalorder %s1022_s16, %s1382_s13  ;;  %s1386_s27 = sshll.u32 %s1479_s30, 4  ;;  %s1387_s27 = int_to_ptr.vmem [resolvable:$false] %s1386_s27 }
 0x495   : > { %s1388_s25 = scalar_lea.vmem %s1387_s27, 256  ;;  %p1389_p6 = scmp.lt.s32.totalorder %s1022_s16, %s1387_s27 }
 0x496   : > { %p1384_p4 = pnand %p1383_p2, %p1599_p3  ;;  %p1390_p7 = scmp.lt.s32.totalorder %s1388_s25, %s1382_s13 }
 0x497   : > { %s1823_s23 = sand.u32 1, %s1819_s18  }
 0x498   : > { %s1822_s20 = smov %s1821_s28  ;;  %s1019_s15 = scalar_lea.hbm %s1821_s28, %s1235_s21 }
 0x499   : > { %s1008_s14 = scalar_lea.sflag [#allocation4], %s1823_s23  ;;  %p1385_p5 = pneg %p1384_p4 }
 0x49a   : > { %p1391_p8 = por %p1390_p7, %p1389_p6 }
 0x49c   : > { %p1392_p10 = pnand %p1391_p8, %p1385_p5 }
 0x49e   : > { %1395 = shalt.err (!%p1392_p10)
}
 0x49f   : > { %s1396_s29 = scalar_lea.hbm %s1019_s15, 128  ;;  %s1400_s18 = scalar_lea.hbm %s1822_s20, 256 }
 0x4a0   : > { %p1397_p11 = scmp.ne.s32.totalorder %s1019_s15, %s1396_s29  ;;  %p1401_p0 = scmp.lt.s32.totalorder %s1019_s15, %s1822_s20 }
 0x4a1   : > { %p1402_p1 = scmp.lt.s32.totalorder %s1400_s18, %s1396_s29 }
 0x4a2   : > { %p1398_p12 = pnand %p1397_p11, %p1599_p3 }
 0x4a3   : > { %p1403_p2 = por %p1402_p1, %p1401_p0 }
 0x4a4   : > { %p1399_p13 = pneg %p1398_p12 }
 0x4a6   : > { %p1404_p4 = pnand %p1403_p2, %p1399_p13 }
 0x4a8   : > { %1407 = shalt.err (!%p1404_p4)
}
 0x4a9   : > { %1298 = dma.vmem_to_hbm [thread:$0]  (%p1599_p3), %s1022_s16, 128, %s1019_s15, %s1008_s14  }
 0x4aa PF: > { %s1824_s26 = sld [smem:[#allocation11_spill]] }
 0x4ab   : > { %s1825_s28 = sld [smem:[#allocation6_spill]] }
 0x4b0   : > { %p1304_p5 = scmp.ge.s32.totalorder %s1824_s26, 2 }
 0x4b1   : > { %s1033_s13 = sand.u32 1, %s1825_s28  }
 0x4b2   : > { %p1301_p6 = pnand %p1304_p5, %p1609_p9  ;;  %s1034_s30 = scalar_lea.sflag [#allocation4], %s1033_s13 }
 0x4b4   : > { %p1302_p7 = pneg %p1301_p6 }
 0x4b6   : > { %1441 = dma.done.wait (%p1302_p7), %s1034_s30, 128  }
 0x4b7   : > { %1443 = vsyncadd (%p1302_p7), %s1034_s30, 4294967168  ;;  %s26_s15 = sadd.s32 1, %s1824_s26   ;;  %s1827_s25 = sld [smem:[#allocation7_spill]] }
 0x4b8   : > { %p23_p8 = scmp.ge.s32.totalorder %s26_s15, 10   ;;  %s1828_s26 = sld [smem:[#allocation8_spill]] }
 0x4b9   : > { %s1829_s27 = sld [smem:[#allocation16_spill]] }
 0x4ba   : > { %s1830_s28 = sld [smem:[#allocation9_spill]]  ;;  %25 = sbr.rel (!%p23_p8) target bundleno = 7 (0x7), region = 145 }
 0x4bb   : > { %s1831_s29 = sld [smem:[#allocation10_spill]] }
 0x4bc   : > { %s1832_s30 = sld [smem:[#allocation12_spill]] }
 0x4bd   : > { %s1833_s14 = sld [smem:[#allocation14_spill]] }
 0x4bf   :  { %1039 = vsyncpa [#allocation4], 1 }
 0x4c0   :  { %1041 = vsyncpa [#allocation4 + $0x1], 1 }

</bundles_post_ra>
